<compile_context>
chip_gen: v5e
topology: v5e:2x2
jax: 0.10.0
libtpu: 0.0.40
codegen_flags: <defaults>
</compile_context>

<pallas_src>
import functools

import jax
import jax.numpy as jnp
from jax import lax
from jax.experimental import pallas as pl
from jax.experimental.pallas import tpu as pltpu

EPS = 1e-5  # PyTorch BatchNorm2d default


def _conv1x1_bn_relu_kernel(x_ref, w_ref, b_ref, g_ref, bt_ref, o_ref,
                            sum_ref, sq_ref, *, inv_count):
    """Fused 1x1 conv + training-mode BN + ReLU (two-pass over the grid).

    x_ref  : (Cin, T)    bf16 input tile (spatial on the 128-lane axis)
    w_ref  : (Cout, Cin) bf16 conv weight
    b_ref  : (Cout, 1)   f32 conv bias
    g_ref  : (Cout, 1)   f32 BN gamma
    bt_ref : (Cout, 1)   f32 BN beta
    o_ref  : (Cout, T)   f32 output tile
    sum_ref, sq_ref : (Cout, 1) f32 VMEM scratch, per-channel sum / sum-of-squares
    """
    p = pl.program_id(0)   # 0 = stats pass, 1 = normalize/write pass
    n = pl.program_id(1)   # batch index
    s = pl.program_id(2)   # spatial tile index

    # 1x1 conv == lane-dense GEMM: (Cout, Cin) @ (Cin, T) -> (Cout, T).
    # bf16 operands, f32 accumulation on the MXU; bias added in f32.
    y = jnp.dot(w_ref[...], x_ref[...], preferred_element_type=jnp.float32)
    y = y + b_ref[...]

    @pl.when((p == 0) & (n == 0) & (s == 0))
    def _init():
        sum_ref[...] = jnp.zeros_like(sum_ref)
        sq_ref[...] = jnp.zeros_like(sq_ref)

    @pl.when(p == 0)
    def _accumulate():
        # streaming per-channel moments (cross-lane reduce -> XLU slot)
        sum_ref[...] += jnp.sum(y, axis=1, keepdims=True)
        sq_ref[...] += jnp.sum(y * y, axis=1, keepdims=True)

    @pl.when(p == 1)
    def _finalize():
        mean = sum_ref[...] * inv_count                       # (Cout, 1)
        var = sq_ref[...] * inv_count - mean * mean           # biased (training-mode) var
        inv_std = lax.rsqrt(var + EPS)
        scale = g_ref[...] * inv_std                          # (Cout, 1)
        shift = bt_ref[...] - mean * scale                    # (Cout, 1)
        o_ref[...] = jnp.maximum(y * scale + shift, 0.0).astype(o_ref.dtype)


def conv1x1_bn_relu_pallas(x_nchw, weight, bias, gamma, beta):
    """x_nchw: (N, Cin, H, W) f32; weight: (Cout, Cin, 1, 1); bias/gamma/beta: (Cout,).
    Returns (N, Cout, H, W) f32, matching Conv1x1.forward (training-mode BN)."""
    N, Cin, H, W = x_nchw.shape
    Cout = weight.shape[0]
    HW = H * W

    # spatial tile on the lane axis: largest "nice" multiple of 128 that divides HW
    T = HW
    for cand in (2048, 1024, 512, 256, 128):
        if HW % cand == 0:
            T = cand
            break
    n_s = HW // T

    # NCHW already has spatial last -> just a reshape, no transpose / no padding.
    x = x_nchw.reshape(N, Cin, HW).astype(jnp.bfloat16)
    w2 = weight.reshape(Cout, Cin).astype(jnp.bfloat16)
    b2 = bias.reshape(Cout, 1).astype(jnp.float32)
    g2 = gamma.reshape(Cout, 1).astype(jnp.float32)
    bt2 = beta.reshape(Cout, 1).astype(jnp.float32)

    kernel = functools.partial(_conv1x1_bn_relu_kernel,
                               inv_count=1.0 / float(N * HW))

    out = pl.pallas_call(
        kernel,
        out_shape=jax.ShapeDtypeStruct((N, Cout, HW), jnp.float32),
        grid_spec=pltpu.PrefetchScalarGridSpec(
            num_scalar_prefetch=0,
            grid=(2, N, n_s),  # (pass, batch, spatial tile); last axis fastest
            in_specs=[
                pl.BlockSpec((None, Cin, T), lambda p, n, s: (n, 0, s)),
                pl.BlockSpec((Cout, Cin), lambda p, n, s: (0, 0)),
                pl.BlockSpec((Cout, 1), lambda p, n, s: (0, 0)),
                pl.BlockSpec((Cout, 1), lambda p, n, s: (0, 0)),
                pl.BlockSpec((Cout, 1), lambda p, n, s: (0, 0)),
            ],
            # During pass 0 the output block index stays pinned at (0, 0, 0), so no
            # un-written block is ever flushed to HBM; pass 1 writes every block once.
            out_specs=pl.BlockSpec((None, Cout, T),
                                   lambda p, n, s: (n * p, 0, s * p)),
            scratch_shapes=[
                pltpu.VMEM((Cout, 1), jnp.float32),   # per-channel sum
                pltpu.VMEM((Cout, 1), jnp.float32),   # per-channel sum of squares
            ],
        ),
        compiler_params=pltpu.CompilerParams(
            dimension_semantics=("arbitrary", "arbitrary", "arbitrary"),
        ),
    )(x, w2, b2, g2, bt2)

    return out.reshape(N, Cout, H, W)


def conv1x1_bn_relu_reference(x_nchw, weight, bias, gamma, beta):
    """Pure-JAX reference for Conv1x1.forward (training-mode BN). The 1x1 conv uses
    the same bf16-operand / f32-accumulation precision as the kernel's MXU path."""
    N, Cin, H, W = x_nchw.shape
    Cout = weight.shape[0]
    xm = x_nchw.reshape(N, Cin, H * W).astype(jnp.bfloat16)
    wm = weight.reshape(Cout, Cin).astype(jnp.bfloat16)
    y = jnp.einsum("oc,ncs->nos", wm, xm, preferred_element_type=jnp.float32)
    y = y + bias.reshape(1, Cout, 1).astype(jnp.float32)
    mean = jnp.mean(y, axis=(0, 2), keepdims=True)
    var = jnp.mean((y - mean) ** 2, axis=(0, 2), keepdims=True)  # biased (training mode)
    z = (y - mean) * lax.rsqrt(var + EPS)
    z = z * gamma.reshape(1, Cout, 1) + beta.reshape(1, Cout, 1)
    z = jnp.maximum(z, 0.0)
    return z.reshape(N, Cout, H, W)


if __name__ == "__main__":
    # Conv1x1(inplanes=4, planes=8): Conv2d(4, 8, kernel_size=1, bias=True)
    N, Cin, H, W = 2, 4, 16, 16
    Cout = 8

    key = jax.random.PRNGKey(0)
    kx, kw, kb = jax.random.split(key, 3)
    x = jax.random.normal(kx, (N, Cin, H, W), dtype=jnp.float32)
    # PyTorch default Conv2d init: U(-1/sqrt(fan_in), 1/sqrt(fan_in)), fan_in = Cin*1*1
    bound = 1.0 / (Cin ** 0.5)
    weight = jax.random.uniform(kw, (Cout, Cin, 1, 1), jnp.float32, -bound, bound)
    bias = jax.random.uniform(kb, (Cout,), jnp.float32, -bound, bound)
    # BatchNorm2d default affine init: gamma = 1, beta = 0
    gamma = jnp.ones((Cout,), jnp.float32)
    beta = jnp.zeros((Cout,), jnp.float32)

    out = jax.block_until_ready(conv1x1_bn_relu_pallas(x, weight, bias, gamma, beta))
    ref = jax.block_until_ready(conv1x1_bn_relu_reference(x, weight, bias, gamma, beta))

    assert out.shape == (N, Cout, H, W), out.shape
    max_err = float(jnp.max(jnp.abs(out - ref)))
    assert jnp.allclose(out, ref, atol=2e-3, rtol=2e-3), max_err
    print("KERNEL_OK")
</pallas_src>

<mosaic_0001>
module attributes {stable_mosaic.version = 11 : i64} {
  func.func @_conv1x1_bn_relu_kernel(%arg0: i32, %arg1: i32, %arg2: i32, %arg3: memref<1x4x256xbf16, #tpu.memory_space<vmem>>, %arg4: memref<8x4xbf16, #tpu.memory_space<vmem>>, %arg5: memref<8x1xf32, #tpu.memory_space<vmem>>, %arg6: memref<8x1xf32, #tpu.memory_space<vmem>>, %arg7: memref<8x1xf32, #tpu.memory_space<vmem>>, %arg8: memref<1x8x256xf32, #tpu.memory_space<vmem>>, %arg9: memref<8x1xf32, #tpu.memory_space<vmem>>, %arg10: memref<8x1xf32, #tpu.memory_space<vmem>>) attributes {dimension_semantics = [#tpu.dimension_semantics<arbitrary>, #tpu.dimension_semantics<arbitrary>, #tpu.dimension_semantics<arbitrary>], iteration_bounds = array<i64: 2, 2, 1>, scalar_prefetch = 0 : i64, scratch_operands = 2 : i64, tpu.core_type = #tpu.core_type<tc>, window_params = [{transform_indices = @transform_0, window_bounds = array<i64: 1, 4, 256>}, {pipeline_mode = #tpu.pipeline_mode<synchronous>, transform_indices = @transform_1, window_bounds = array<i64: 8, 4>}, {pipeline_mode = #tpu.pipeline_mode<synchronous>, transform_indices = @transform_2, window_bounds = array<i64: 8, 1>}, {pipeline_mode = #tpu.pipeline_mode<synchronous>, transform_indices = @transform_3, window_bounds = array<i64: 8, 1>}, {pipeline_mode = #tpu.pipeline_mode<synchronous>, transform_indices = @transform_4, window_bounds = array<i64: 8, 1>}, {transform_indices = @transform_5, window_bounds = array<i64: 1, 8, 256>}]} {
    %c0 = arith.constant 0 : index
    %c0_0 = arith.constant 0 : index
    %0 = vector.load %arg4[%c0, %c0_0] : memref<8x4xbf16, #tpu.memory_space<vmem>>, vector<8x4xbf16>
    %c0_1 = arith.constant 0 : index
    %c0_2 = arith.constant 0 : index
    %c0_3 = arith.constant 0 : index
    %1 = vector.load %arg3[%c0_1, %c0_2, %c0_3] : memref<1x4x256xbf16, #tpu.memory_space<vmem>>, vector<1x4x256xbf16>
    %2 = vector.shape_cast %1 : vector<1x4x256xbf16> to vector<4x256xbf16>
    %cst = arith.constant dense<0.000000e+00> : vector<8x256xf32>
    %3 = tpu.matmul %0, %2, %cst {dimension_numbers = #tpu.dot_dimension_numbers<[1], [0], [0], [1], [0, 0, 1, 1], [], []>} : vector<8x4xbf16>, vector<4x256xbf16>, vector<8x256xf32> -> vector<8x256xf32>
    %c0_4 = arith.constant 0 : index
    %c0_5 = arith.constant 0 : index
    %4 = vector.load %arg5[%c0_4, %c0_5] : memref<8x1xf32, #tpu.memory_space<vmem>>, vector<8x1xf32>
    %5 = vector.broadcast %4 : vector<8x1xf32> to vector<8x256xf32>
    %6 = arith.addf %3, %5 : vector<8x256xf32>
    %c0_i32 = arith.constant 0 : i32
    %7 = arith.cmpi eq, %arg0, %c0_i32 : i32
    %c0_i32_6 = arith.constant 0 : i32
    %8 = arith.cmpi eq, %arg1, %c0_i32_6 : i32
    %9 = arith.andi %7, %8 : i1
    %c0_i32_7 = arith.constant 0 : i32
    %10 = arith.cmpi eq, %arg2, %c0_i32_7 : i32
    %11 = arith.andi %9, %10 : i1
    %12 = arith.extui %11 : i1 to i32
    %c0_i32_8 = arith.constant 0 : i32
    %13 = arith.cmpi ne, %12, %c0_i32_8 : i32
    scf.if %13 {
      %cst_12 = arith.constant 0.000000e+00 : f32
      %20 = vector.broadcast %cst_12 : f32 to vector<8x1xf32>
      %c0_13 = arith.constant 0 : index
      %c0_14 = arith.constant 0 : index
      %21 = vector.load %arg9[%c0_13, %c0_14] : memref<8x1xf32, #tpu.memory_space<vmem>>, vector<8x1xf32>
      tpu.vector_store %arg9[%c0_13, %c0_14], %20 {strides = array<i32>} : memref<8x1xf32, #tpu.memory_space<vmem>>, vector<8x1xf32>,
      %cst_15 = arith.constant 0.000000e+00 : f32
      %22 = vector.broadcast %cst_15 : f32 to vector<8x1xf32>
      %c0_16 = arith.constant 0 : index
      %c0_17 = arith.constant 0 : index
      %23 = vector.load %arg10[%c0_16, %c0_17] : memref<8x1xf32, #tpu.memory_space<vmem>>, vector<8x1xf32>
      tpu.vector_store %arg10[%c0_16, %c0_17], %22 {strides = array<i32>} : memref<8x1xf32, #tpu.memory_space<vmem>>, vector<8x1xf32>,
    } else {
    }
    %c0_i32_9 = arith.constant 0 : i32
    %14 = arith.cmpi eq, %arg0, %c0_i32_9 : i32
    %15 = arith.extui %14 : i1 to i32
    %c0_i32_10 = arith.constant 0 : i32
    %16 = arith.cmpi ne, %15, %c0_i32_10 : i32
    scf.if %16 {
      %c0_12 = arith.constant 0 : index
      %c0_13 = arith.constant 0 : index
      %20 = vector.load %arg9[%c0_12, %c0_13] : memref<8x1xf32, #tpu.memory_space<vmem>>, vector<8x1xf32>
      %cst_14 = arith.constant dense<0.000000e+00> : vector<8xf32>
      %21 = vector.multi_reduction <add>, %6, %cst_14 [1] : vector<8x256xf32> to vector<8xf32>
      %22 = vector.shape_cast %21 : vector<8xf32> to vector<8x1xf32>
      %23 = arith.addf %20, %22 : vector<8x1xf32>
      %c0_15 = arith.constant 0 : index
      %c0_16 = arith.constant 0 : index
      %24 = vector.load %arg9[%c0_15, %c0_16] : memref<8x1xf32, #tpu.memory_space<vmem>>, vector<8x1xf32>
      tpu.vector_store %arg9[%c0_15, %c0_16], %23 {strides = array<i32>} : memref<8x1xf32, #tpu.memory_space<vmem>>, vector<8x1xf32>,
      %c0_17 = arith.constant 0 : index
      %c0_18 = arith.constant 0 : index
      %25 = vector.load %arg10[%c0_17, %c0_18] : memref<8x1xf32, #tpu.memory_space<vmem>>, vector<8x1xf32>
      %26 = arith.mulf %6, %6 : vector<8x256xf32>
      %cst_19 = arith.constant dense<0.000000e+00> : vector<8xf32>
      %27 = vector.multi_reduction <add>, %26, %cst_19 [1] : vector<8x256xf32> to vector<8xf32>
      %28 = vector.shape_cast %27 : vector<8xf32> to vector<8x1xf32>
      %29 = arith.addf %25, %28 : vector<8x1xf32>
      %c0_20 = arith.constant 0 : index
      %c0_21 = arith.constant 0 : index
      %30 = vector.load %arg10[%c0_20, %c0_21] : memref<8x1xf32, #tpu.memory_space<vmem>>, vector<8x1xf32>
      tpu.vector_store %arg10[%c0_20, %c0_21], %29 {strides = array<i32>} : memref<8x1xf32, #tpu.memory_space<vmem>>, vector<8x1xf32>,
    } else {
    }
    %c1_i32 = arith.constant 1 : i32
    %17 = arith.cmpi eq, %arg0, %c1_i32 : i32
    %18 = arith.extui %17 : i1 to i32
    %c0_i32_11 = arith.constant 0 : i32
    %19 = arith.cmpi ne, %18, %c0_i32_11 : i32
    scf.if %19 {
      %c0_12 = arith.constant 0 : index
      %c0_13 = arith.constant 0 : index
      %20 = vector.load %arg9[%c0_12, %c0_13] : memref<8x1xf32, #tpu.memory_space<vmem>>, vector<8x1xf32>
      %cst_14 = arith.constant 0.001953125 : f32
      %21 = vector.broadcast %cst_14 : f32 to vector<8x1xf32>
      %22 = arith.mulf %20, %21 : vector<8x1xf32>
      %c0_15 = arith.constant 0 : index
      %c0_16 = arith.constant 0 : index
      %23 = vector.load %arg10[%c0_15, %c0_16] : memref<8x1xf32, #tpu.memory_space<vmem>>, vector<8x1xf32>
      %cst_17 = arith.constant 0.001953125 : f32
      %24 = vector.broadcast %cst_17 : f32 to vector<8x1xf32>
      %25 = arith.mulf %23, %24 : vector<8x1xf32>
      %26 = arith.mulf %22, %22 : vector<8x1xf32>
      %27 = arith.subf %25, %26 : vector<8x1xf32>
      %cst_18 = arith.constant 9.99999974E-6 : f32
      %28 = vector.broadcast %cst_18 : f32 to vector<8x1xf32>
      %29 = arith.addf %27, %28 : vector<8x1xf32>
      %30 = math.rsqrt %29 : vector<8x1xf32>
      %c0_19 = arith.constant 0 : index
      %c0_20 = arith.constant 0 : index
      %31 = vector.load %arg6[%c0_19, %c0_20] : memref<8x1xf32, #tpu.memory_space<vmem>>, vector<8x1xf32>
      %32 = arith.mulf %31, %30 : vector<8x1xf32>
      %c0_21 = arith.constant 0 : index
      %c0_22 = arith.constant 0 : index
      %33 = vector.load %arg7[%c0_21, %c0_22] : memref<8x1xf32, #tpu.memory_space<vmem>>, vector<8x1xf32>
      %34 = arith.mulf %22, %32 : vector<8x1xf32>
      %35 = arith.subf %33, %34 : vector<8x1xf32>
      %36 = vector.broadcast %32 : vector<8x1xf32> to vector<8x256xf32>
      %37 = arith.mulf %6, %36 : vector<8x256xf32>
      %38 = vector.broadcast %35 : vector<8x1xf32> to vector<8x256xf32>
      %39 = arith.addf %37, %38 : vector<8x256xf32>
      %cst_23 = arith.constant 0.000000e+00 : f32
      %40 = vector.broadcast %cst_23 : f32 to vector<8x256xf32>
      %41 = arith.maximumf %39, %40 : vector<8x256xf32>
      %c0_24 = arith.constant 0 : index
      %c0_25 = arith.constant 0 : index
      %c0_26 = arith.constant 0 : index
      %42 = vector.load %arg8[%c0_24, %c0_25, %c0_26] : memref<1x8x256xf32, #tpu.memory_space<vmem>>, vector<1x8x256xf32>
      %43 = vector.shape_cast %42 : vector<1x8x256xf32> to vector<8x256xf32>
      %44 = vector.shape_cast %41 : vector<8x256xf32> to vector<1x8x256xf32>
      tpu.vector_store %arg8[%c0_24, %c0_25, %c0_26], %44 {strides = array<i32>} : memref<1x8x256xf32, #tpu.memory_space<vmem>>, vector<1x8x256xf32>,
    } else {
    }
    return
  }
  func.func @transform_0(%arg0: i32, %arg1: i32, %arg2: i32) -> (i32, i32, i32) {
    %c0_i32 = arith.constant 0 : i32
    %c0_i32_0 = arith.constant 0 : i32
    return %arg1, %c0_i32, %arg2 : i32, i32, i32
  }
  func.func @transform_1(%arg0: i32, %arg1: i32, %arg2: i32) -> (i32, i32) {
    %c0_i32 = arith.constant 0 : i32
    %c0_i32_0 = arith.constant 0 : i32
    %c0_i32_1 = arith.constant 0 : i32
    return %c0_i32, %c0_i32_0 : i32, i32
  }
  func.func @transform_2(%arg0: i32, %arg1: i32, %arg2: i32) -> (i32, i32) {
    %c0_i32 = arith.constant 0 : i32
    %c0_i32_0 = arith.constant 0 : i32
    %c0_i32_1 = arith.constant 0 : i32
    return %c0_i32, %c0_i32_0 : i32, i32
  }
  func.func @transform_3(%arg0: i32, %arg1: i32, %arg2: i32) -> (i32, i32) {
    %c0_i32 = arith.constant 0 : i32
    %c0_i32_0 = arith.constant 0 : i32
    %c0_i32_1 = arith.constant 0 : i32
    return %c0_i32, %c0_i32_0 : i32, i32
  }
  func.func @transform_4(%arg0: i32, %arg1: i32, %arg2: i32) -> (i32, i32) {
    %c0_i32 = arith.constant 0 : i32
    %c0_i32_0 = arith.constant 0 : i32
    %c0_i32_1 = arith.constant 0 : i32
    return %c0_i32, %c0_i32_0 : i32, i32
  }
  func.func @transform_5(%arg0: i32, %arg1: i32, %arg2: i32) -> (i32, i32, i32) {
    %0 = arith.muli %arg1, %arg0 : i32
    %1 = arith.muli %arg2, %arg0 : i32
    %c0_i32 = arith.constant 0 : i32
    %c0_i32_0 = arith.constant 0 : i32
    return %0, %c0_i32, %1 : i32, i32, i32
  }
}

</mosaic_0001>

<bundles_post_ra>
// kernel: tpu_custom_call.1
= control target key start
LH: loop header
LB: loop body
LE: loop exit
PB: predicated region body
PF: predicated region fallthrough
CT: control target
= control target key end

     0   :  { %s867_s0 = inlined_call_operand.vmem [shape: bf16[2,4,256], index: 0, kind: input, shape index: {}]   ;;  %s868_s1 = inlined_call_operand.vmem [shape: bf16[8,4], index: 1, kind: input, shape index: {}]   ;;  %s869_s2 = inlined_call_operand.vmem [shape: f32[8,1], index: 2, kind: input, shape index: {}]   ;;  %s870_s3 = inlined_call_operand.vmem [shape: f32[8,1], index: 3, kind: input, shape index: {}]   ;;  %s871_s4 = inlined_call_operand.vmem [shape: f32[8,1], index: 4, kind: input, shape index: {}]   ;;  %s872_s5 = inlined_call_operand.hbm [shape: f32[2,8,256], index: 5, kind: output, shape index: {}]  }
   0x1   :  { %873 = sst [smem:[#allocation7_spill]] %s867_s0 }
   0x2   :  { %10 = vsyncpa [#allocation5], 0 }
   0x3   :  { %12 = vsyncpa [#allocation5 + $0x1], 0  ;;  %s719_s18 = smov 0   ;;  %s721_s19 = smov 0  }
   0x4   :  { %s723_s20 = smov 0   ;;  %s725_s21 = smov 0  }
   0x5   :  { %s727_s22 = smov 0   ;;  %s729_s23 = smov 0  }
   0x6   :  { %s731_s24 = smov 0   ;;  %s733_s25 = smov 0  }
   0x7 LB: > { %s492_s26 = sadd.s32 4294967295, %s684_s25   ;;  %s493_s27 = sadd.s32 4294967294, %s684_s25   ;;  %s684_s25 = sphi %s733_s25, %s18_s25   ;;  %s680_s24 = sphi %s731_s24, %s883_s24   ;;  %s676_s23 = sphi %s729_s23, %s882_s23   ;;  %s672_s22 = sphi %s727_s22, %s881_s22   ;;  %s668_s21 = sphi %s725_s21, %s880_s21   ;;  %s664_s20 = sphi %s723_s20, %s879_s20   ;;  %s660_s19 = sphi %s721_s19, %s878_s19   ;;  %s656_s18 = sphi %s719_s18, %s877_s18  }
   0x8   : > { %s33_s28 = sadd.s32 1, %s676_s23  ;;  %s37_s29 = sadd.s32 1, %s680_s24 }
   0x9   : > { %p35_p0 = scmp.ge.s32.totalorder %s33_s28, 2  ;;  %s153_s30 = smul.u32 %s676_s23, %s680_s24 }
   0xa   : > { %p172_p1 = scmp.ne.s32.totalorder %s664_s20, %s660_s19  ;;  %p173_p2 = scmp.eq.s32.totalorder %s492_s26, 3 }
   0xb   : > { %s885_s28 = smov (%p35_p0, %s33_s28), 0  ;;  %s887_s29 = smov (!%p35_p0, %s37_s29), %s680_s24 }
   0xc   : > { %p178_p3 = scmp.ne.s32.totalorder %s660_s19, %s656_s18  ;;  %p39_p4 = scmp.ge.s32.totalorder %s887_s29, 2 }
   0xd   : > { %p179_p5 = scmp.eq.s32.totalorder %s493_s27, 3  ;;  %p772_p6 = por %p173_p2, %p172_p1 }
   0xe   : > { %p496_p7 = scmp.ge.s32.totalorder %s684_s25, 1  ;;  %s889_s29 = smov (%p39_p4, %s887_s29), 0 }
   0xf   : > { %p779_p8 = por %p179_p5, %p178_p3  ;;  %p222_p9 = scmp.lt.s32.totalorder %s684_s25, 5 }
  0x10   : > { %s155_s8 = smul.u32 %s889_s29, %s885_s28  ;;  %s162_s10 = sadd.s32 1, %s664_s20 }
  0x11   : > { %p223_p10 = pnand %p496_p7, %p222_p9 }
  0x12   : > { %s157_s9 = ssub.s32 %s153_s30, %s155_s8  ;;  %s251_s12 = sand.u32 (!%p223_p10), 1, %s660_s19  }
  0x13   : > { %p160_p11 = scmp.eq.s32.totalorder %s157_s9, 0  ;;  %226 = sbr.rel (%p223_p10) target bundleno = 497 (0x1f1), region = 40 }
  0x14   : > { %p255_p12 = scmp.lt.s32.totalorder (!%p223_p10), %s668_s21, 1  ;;  %s794_s13 = sshll.u32 (!%p223_p10), %s251_s12, 4 }
  0x15   : > { %s788_s11 = scalar_select %p160_p11, %s664_s20, %s162_s10  }
  0x16   : > { %s876_s0 = sld [smem:[#allocation7_spill]] (!%p223_p10)  ;;  %p315_p13 = scmp.eq.s32.totalorder (!%p223_p10), %s672_s22, 0 }
  0x17   : > { %p316_p0 = scmp.eq.s32.totalorder (!%p223_p10), %s668_s21, 0  ;;  %s809_s10 = scalar_lea.vmem (!%p223_p10), [#allocation4], %s794_s13 }
  0x18   : > { %v270_v0 = vld [vmem:[%s869_s2] sm:$0xff]  ;;  %v686_v1 = vmov 0   ;;  %s256_s16 = scalar_select %p255_p12, %s668_s21, 1  ;;  %vm284_vm0 = vcmask 1041408   ;;  %vm280_vm1 = vcmask 31744  }
  0x19   : > { %586 = vset.pattern.permute.xlu0 %v686_v1  ;;  %v268_v7 = vld [vmem:[%s868_s1] sm:$0xf]  ;;  %p317_p1 = pnand %p316_p0, %p315_p13 }
  0x1a   : > { %273 = vperm.xlu0 %586, %v270_v0   ;;  %s510_s17 = sshll.u32 %s256_s16, 2 }
  0x1c   : > { %s262_s30 = scalar_lea.vmem %s876_s0, %s510_s17 }
  0x1d   : > { %v269_v2 = vld [vmem:[%s262_s30] sm:$0xf] }
  0x1e   : > { %277 = vst [vmem:[#allocation1] ss:$4 sm:$0xff] %v269_v2 }
  0x25   : > { %v278_v3 = vld.sshfl [vmem:[#allocation1] sm:$0xff pattern:$0x73625140]  ;;  %v279_v4 = vld.sshfl [vmem:[#allocation1 + $0x8] sm:$0xff pattern:$0x73625140] }
  0x26   : > { %v285_v5 = vsel %vm284_vm0, %v278_v3, 0  ;;  %v287_v6 = vsel %vm284_vm0, %v279_v4, 0 }
  0x27   : > { %296 = vmatpush.bf16.msra.mxu0 %v285_v5  ;;  %309 = vmatpush.bf16.msra.mxu1 %v287_v6 }
  0x2a   : > { %500 = vmatmul.msk.bf16.vlgmr.msra.gmra.mxu0 %vm280_vm1, %v268_v7  ;;  %501 = vmatmul.msk.bf16.vlgmr.msra.gmra.mxu1 %vm280_vm1, %v268_v7 }
  0x8c   : > { %v274_v8 = vpop.permute.xlu0 %273 }
  0xa7   : > { %v298_v9 = vpop.f32.mrf.mxu0  ;;  %v311_v10 = vpop.f32.mrf.mxu1 }
  0xa8   : > { %v299_v11 = vadd.f32 %v298_v9, %v274_v8  ;;  %v312_v12 = vadd.f32 %v311_v10, %v274_v8 }
  0xab   : > { %323 = sbr.rel (%p317_p1) target bundleno = 179 (0xb3), region = 44 }
  0xaf   : > { %v300_v13 = vpop.f32.mrf.mxu0  ;;  %v313_v14 = vpop.f32.mrf.mxu1 }
  0xb0   : > { %vm324_vm2 = vcmask 7168   ;;  %v687_v15 = vmov 0.0  }
  0xb1   : > { %325 = vst.msk [vmem:[#allocation2] sm:$0xff] %vm324_vm2, %v687_v15 }
  0xb2   : > { %326 = vst.msk [vmem:[#allocation3] sm:$0xff] %vm324_vm2, %v687_v15 }
  0xb3 PF: > { %p503_p2 = scmp.ne.s32.totalorder %s672_s22, 0 }
  0xb5   : > { %329 = sbr.rel (%p503_p2) target bundleno = 315 (0x13b), region = 48 }
  0xba   : > { %v331_v16 = vadd.f32 %v312_v12, %v299_v11  ;;  %v338_v17 = vmul.f32 %v299_v11, %v299_v11  ;;  %v339_v18 = vmul.f32 %v312_v12, %v312_v12  ;;  %v330_v20 = vld [vmem:[#allocation2] sm:$0xff]  ;;  %vm335_vm3 = vcmask 7168   ;;  %v337_v23 = vld [vmem:[#allocation3] sm:$0xff] }
  0xbc   : > { %332 = vadd.xlane.f32.xlu0 %v331_v16  ;;  %v340_v19 = vadd.f32 %v339_v18, %v338_v17 }
  0xc4   : > { %341 = vadd.xlane.f32.xlu0 %v340_v19 }
 0x12f   : > { %v333_v21 = vpop.xlane.xlu0 %332 }
 0x130   : > { %v334_v22 = vadd.f32 %v333_v21, %v330_v20 }
 0x132   : > { %336 = vst.msk [vmem:[#allocation2] sm:$0xff] %vm335_vm3, %v334_v22 }
 0x137   : > { %v342_v24 = vpop.xlane.xlu0 %341 }
 0x138   : > { %v343_v25 = vadd.f32 %v342_v24, %v337_v23 }
 0x13a   : > { %344 = vst.msk [vmem:[#allocation3] sm:$0xff] %vm335_vm3, %v343_v25 }
 0x13b PF: > { %p504_p3 = scmp.ne.s32.totalorder %s672_s22, 1 }
 0x13d   : > { %348 = sbr.rel (%p504_p3) target bundleno = 480 (0x1e0), region = 52 }
 0x142   : > { %v349_v26 = vld [vmem:[#allocation2] sm:$0xff]  ;;  %v351_v27 = vld [vmem:[#allocation3] sm:$0xff]  ;;  %v688_v28 = vmov 0   ;;  %v366_v40 = vld [vmem:[%s870_s3] sm:$0xff] }
 0x143   : > { %587 = vset.pattern.permute.xlu0 %v688_v28  ;;  %v350_v29 = vmul.f32 0.001953125, %v349_v26  ;;  %v352_v30 = vmul.f32 0.001953125, %v351_v27  ;;  %v368_v44 = vld [vmem:[%s871_s4] sm:$0xff] }
 0x145   : > { %v353_v31 = vmul.f32 %v350_v29, %v350_v29 }
 0x147   : > { %v354_v32 = vsub.f32 %v352_v30, %v353_v31 }
 0x149   : > { %v355_v33 = vadd.f32 1e-05, %v354_v32 }
 0x14b   : > { %588 = vrsqrt.f32 %v355_v33  ;;  %vm362_vm4 = vweird.f32 %v355_v33 }
 0x151   : > { %v589_v34 = vpop.eup %588 }
 0x152   : > { %v357_v35 = vmul.f32 %v589_v34, %v355_v33  ;;  %vm363_vm5 = vweird.f32 %v589_v34 }
 0x153   : > { %vm364_vm6 = vmor %vm362_vm4, %vm363_vm5 }
 0x154   : > { %v358_v36 = vmul.f32 %v589_v34, %v357_v35 }
 0x156   : > { %v359_v37 = vmul.f32 0.5, %v358_v36 }
 0x158   : > { %v360_v38 = vsub.f32 1.5, %v359_v37 }
 0x15a   : > { %v361_v39 = vmul.f32 %v589_v34, %v360_v38 }
 0x15c   : > { %v365_v41 = vsel %vm364_vm6, %v589_v34, %v361_v39 }
 0x15d   : > { %v367_v42 = vmul.f32 %v366_v40, %v365_v41 }
 0x15f   : > { %373 = vperm.xlu0 %587, %v367_v42   ;;  %v369_v43 = vmul.f32 %v367_v42, %v350_v29 }
 0x161   : > { %v370_v45 = vsub.f32 %v368_v44, %v369_v43 }
 0x167   : > { %380 = vperm.xlu0 %587, %v370_v45  }
 0x1d1   : > { %v374_v46 = vpop.permute.xlu0 %373 }
 0x1d2   : > { %v376_v47 = vmul.f32 %v374_v46, %v299_v11  ;;  %v377_v48 = vmul.f32 %v374_v46, %v312_v12 }
 0x1d9   : > { %v381_v49 = vpop.permute.xlu0 %380 }
 0x1da   : > { %v383_v50 = vadd.f32 %v381_v49, %v376_v47  ;;  %v384_v51 = vadd.f32 %v381_v49, %v377_v48 }
 0x1dc   : > { %v385_v52 = vmax.f32 %v383_v50, 0.0  ;;  %v386_v53 = vmax.f32 %v384_v51, 0.0 }
 0x1de   : > { %387 = vst [vmem:[%s809_s10] sm:$0xff] %v385_v52 }
 0x1df   : > { %388 = vst [vmem:[%s809_s10 + $0x8] sm:$0xff] %v386_v53 }
 0x1e0 PF: > { %s397_s17 = smul.u32 %s668_s21, %s672_s22  ;;  %s407_s26 = sshll.u32 %s809_s10, 4  ;;  %s408_s26 = int_to_ptr.vmem [resolvable:$true] %s407_s26 }
 0x1e1   : > { %s390_s14 = scalar_lea.sflag [#allocation5], %s251_s12  ;;  %s610_s22 = scalar_lea.hbm %s872_s5, 32 }
 0x1e2   : > { %s511_s27 = sshll.u32 %s397_s17, 4 }
 0x1e3   : > { %s405_s9 = scalar_lea.hbm %s872_s5, %s511_s27 }
 0x1e4   : > { %s409_s13 = sshll.u32 %s405_s9, 4  ;;  %s410_s13 = int_to_ptr.hbm [resolvable:$true] %s409_s13 }
 0x1e5   : > { %s604_s15 = sshra.s32 %s410_s13, 4  ;;  %s605_s15 = int_to_ptr.hbm [resolvable:$true] %s604_s15 }
 0x1e6   : > { %s606_s16 = scalar_lea.hbm %s605_s15, 16  ;;  %p611_p9 = scmp.lt.s32.totalorder %s605_s15, %s872_s5 }
 0x1e7   : > { %p607_p4 = scmp.ne.s32.totalorder %s605_s15, %s606_s16  ;;  %p612_p10 = scmp.lt.s32.totalorder %s610_s22, %s606_s16 }
 0x1e9   : > { %p608_p5 = pnand %p607_p4, %p772_p6  ;;  %p613_p11 = por %p612_p10, %p611_p9 }
 0x1eb   : > { %p609_p7 = pneg %p608_p5 }
 0x1ed   : > { %p614_p12 = pnand %p613_p11, %p609_p7 }
 0x1ef   : > { %617 = shalt.err (!%p614_p12)
}
 0x1f0   : > { %512 = dma.vmem_to_hbm [thread:$0]  (%p772_p6), %s408_s26, 256, %s410_s13, %s390_s14  }
 0x1f1 PF: > { %p518_p13 = scmp.ge.s32.totalorder %s684_s25, 2  ;;  %s421_s12 = sand.u32 1, %s656_s18  }
 0x1f2   : > { %s422_s0 = scalar_lea.sflag [#allocation5], %s421_s12 }
 0x1f3   : > { %p515_p0 = pnand %p518_p13, %p779_p8 }
 0x1f5   : > { %p516_p1 = pneg %p515_p0 }
 0x1f7   : > { %651 = dma.done.wait (%p516_p1), %s422_s0, 256  }
 0x1f8   : > { %653 = vsyncadd (%p516_p1), %s422_s0, 4294967040  ;;  %s18_s25 = sadd.s32 1, %s684_s25   ;;  %s877_s18 = smov %s660_s19 }
 0x1f9   : > { %p15_p2 = scmp.ge.s32.totalorder %s18_s25, 6   ;;  %s878_s19 = smov %s664_s20 }
 0x1fa   : > { %s879_s20 = smov %s788_s11  ;;  %s880_s21 = smov %s676_s23 }
 0x1fb   : > { %s881_s22 = smov %s680_s24  ;;  %s882_s23 = smov %s885_s28 }
 0x1fc   : > { %s883_s24 = smov %s889_s29  ;;  %17 = sbr.rel (!%p15_p2) target bundleno = 7 (0x7), region = 87 }
 0x201   :  { %428 = vsyncpa [#allocation5], 1 }
 0x202   :  { %430 = vsyncpa [#allocation5 + $0x1], 1 }

</bundles_post_ra>
